<compile_context>
chip_gen: v6e
topology: v6e:2x2x1
jax: 0.10.0
libtpu: 0.0.40
codegen_flags: <defaults>
</compile_context>

<pallas_src>
import functools
import math

import jax
import jax.numpy as jnp
from jax import lax
from jax.experimental import pallas as pl
from jax.experimental.pallas import tpu as pltpu

LN_EPS = 1e-5          # float32 branch of the torch LayerNorm
SQRT2 = math.sqrt(2.0)


def _layernorm(x, g, eps=LN_EPS):
    # torch: var(dim=-1, unbiased=False), mean(dim=-1); gain-only (no bias)
    mean = jnp.mean(x, axis=-1, keepdims=True)
    var = jnp.mean(jnp.square(x - mean), axis=-1, keepdims=True)
    return (x - mean) * lax.rsqrt(var + eps) * g


# ----------------------------------------------------------------------------
# Standalone LayerNorm kernel (only used for the degenerate depth == 0 case;
# norm_in / norm_out are otherwise fused into the layer kernels below)
# ----------------------------------------------------------------------------
def layernorm_kernel(x_ref, g_ref, o_ref):
    o_ref[0] = _layernorm(x_ref[0], g_ref[...])


def layernorm(x, g):
    b, n, d = x.shape
    return pl.pallas_call(
        layernorm_kernel,
        out_shape=jax.ShapeDtypeStruct((b, n, d), x.dtype),
        grid=(b,),
        in_specs=[
            pl.BlockSpec((1, n, d), lambda i: (i, 0, 0)),
            pl.BlockSpec((1, d), lambda i: (0, 0)),
        ],
        out_specs=pl.BlockSpec((1, n, d), lambda i: (i, 0, 0)),
        compiler_params=pltpu.CompilerParams(dimension_semantics=("parallel",)),
    )(x, g.reshape(1, d))


# ----------------------------------------------------------------------------
# Fused transformer layer kernel:
#   [x = LN_in(x)]                               (first layer only)
#   x = x + LN_out(W_out @ Attn(LN1(x)))         (PreNorm Attention + residual)
#   x = x + W2 @ LN_ff(GEGLU(W1 @ LN2(x)))       (PreNorm FeedForward + residual)
#   [x = LN_final(x)]                            (last layer only)
# one grid step == one batch element
# ----------------------------------------------------------------------------
def transformer_layer_kernel(x_ref, bias_ref,
                             ing_ref, ln1_ref, wqkv_ref, wout_ref, oln_ref,
                             ln2_ref, wff1_ref, ffln_ref, wff2_ref, outg_ref,
                             o_ref, *, heads, dim_head, causal,
                             fuse_norm_in, fuse_norm_out):
    f32 = jnp.float32
    bf16 = jnp.bfloat16
    neg = -jnp.finfo(f32).max
    scale = dim_head ** (-0.5)
    inner = heads * dim_head

    x = x_ref[0]                                   # (n, dim) f32 residual stream
    n, d = x.shape
    if fuse_norm_in:                               # fused norm_in (first layer)
        x = _layernorm(x, ing_ref[...])

    # Hoisted additive attention bias: key-padding (precomputed in wrapper) and,
    # if causal, the upper-triangular bias — built ONCE, reused by every head.
    bias = bias_ref[0]                             # (1, n) f32, values {0, -max}
    if causal:
        row = lax.broadcasted_iota(jnp.int32, (n, n), 0)
        col = lax.broadcasted_iota(jnp.int32, (n, n), 1)
        causal_bias = jnp.where(col > row, neg, 0.0).astype(f32)
        bias = jnp.maximum(bias + causal_bias, neg)        # (n, n), clamp: no -inf

    # ---- attention branch (PreNorm) ----
    xn = _layernorm(x, ln1_ref[...])
    # bf16 operands, f32 accumulation on the MXU
    qkv = jnp.dot(xn.astype(bf16), wqkv_ref[...],
                  preferred_element_type=f32)               # (n, 3*inner) f32

    acc = jnp.zeros((n, d), f32)                   # attention output already in `dim`
    for h in range(heads):
        lo, hi = h * dim_head, (h + 1) * dim_head
        qh = (qkv[:, lo:hi] * scale).astype(bf16)            # (n, dh)
        kh = qkv[:, inner + lo:inner + hi].astype(bf16)      # (n, dh)
        vh = qkv[:, 2 * inner + lo:2 * inner + hi].astype(bf16)
        sim = lax.dot_general(qh, kh, (((1,), (1,)), ((), ())),
                              preferred_element_type=f32)    # (n, n) = q @ k^T
        sim = sim + bias                                     # one vadd per head
        sim = sim - jnp.max(sim, axis=-1, keepdims=True)     # f32 softmax
        p = jnp.exp(sim)
        attn = p * pl.reciprocal(jnp.sum(p, axis=-1, keepdims=True), approx=True)
        oh = jnp.dot(attn.astype(bf16), vh, preferred_element_type=f32)   # (n, dh)
        # fold W_out into the head loop: no lane-axis concat, accumulate in f32
        acc = acc + jnp.dot(oh.astype(bf16), wout_ref[lo:hi, :],
                            preferred_element_type=f32)      # (n, dim)
    x1 = x + _layernorm(acc, oln_ref[...])

    # ---- feedforward branch (PreNorm GEGLU) ----
    xn2 = _layernorm(x1, ln2_ref[...])
    h1 = jnp.dot(xn2.astype(bf16), wff1_ref[...],
                 preferred_element_type=f32)                 # (n, 2*ff_inner)
    ff_inner = wff1_ref.shape[1] // 2
    a = h1[:, :ff_inner]
    gate = h1[:, ff_inner:]
    gelu_gate = 0.5 * gate * (1.0 + lax.erf(gate / SQRT2))   # exact (erf) GELU
    gg = _layernorm(a * gelu_gate, ffln_ref[...])
    ff = jnp.dot(gg.astype(bf16), wff2_ref[...], preferred_element_type=f32)
    x2 = x1 + ff

    if fuse_norm_out:                              # fused norm_out (last layer)
        x2 = _layernorm(x2, outg_ref[...])
    o_ref[0] = x2.astype(o_ref.dtype)


def transformer_layer(x, mask_bias, p, in_g, out_g, *, heads, dim_head,
                      causal, fuse_norm_in, fuse_norm_out):
    b, n, d = x.shape
    inner = heads * dim_head
    ff_inner = p["w_ff1"].shape[1] // 2
    bf16 = jnp.bfloat16

    kern = functools.partial(transformer_layer_kernel, heads=heads,
                             dim_head=dim_head, causal=causal,
                             fuse_norm_in=fuse_norm_in,
                             fuse_norm_out=fuse_norm_out)

    def const(shape):
        # weights / gains use the same block at every grid step -> single-buffer
        # them (halves their VMEM footprint; matters on v7x's 64 MiB VMEM).
        return pl.BlockSpec(shape, lambda i, _s=shape: (0,) * len(_s),
                            pipeline_mode=pl.Buffered(1))

    return pl.pallas_call(
        kern,
        out_shape=jax.ShapeDtypeStruct((b, n, d), x.dtype),
        grid=(b,),
        in_specs=[
            pl.BlockSpec((1, n, d), lambda i: (i, 0, 0)),   # x
            pl.BlockSpec((1, 1, n), lambda i: (i, 0, 0)),   # additive key-mask bias
            const((1, d)),                                  # norm_in gain
            const((1, d)),                                  # ln1 gain
            const((d, 3 * inner)),                          # W_qkv (bf16)
            const((inner, d)),                              # W_out (bf16)
            const((1, d)),                                  # attn out-LN gain
            const((1, d)),                                  # ln2 gain
            const((d, 2 * ff_inner)),                       # W_ff1 (bf16)
            const((1, ff_inner)),                           # ff-LN gain
            const((ff_inner, d)),                           # W_ff2 (bf16)
            const((1, d)),                                  # norm_out gain
        ],
        out_specs=pl.BlockSpec((1, n, d), lambda i: (i, 0, 0)),
        compiler_params=pltpu.CompilerParams(
            dimension_semantics=("parallel",),
            vmem_limit_bytes=64 * 1024 * 1024),
    )(x,
      mask_bias,
      in_g.reshape(1, d), p["ln1_g"].reshape(1, d),
      p["w_qkv"].astype(bf16), p["w_out"].astype(bf16),
      p["out_ln_g"].reshape(1, d), p["ln2_g"].reshape(1, d),
      p["w_ff1"].astype(bf16), p["ffln_g"].reshape(1, ff_inner),
      p["w_ff2"].astype(bf16), out_g.reshape(1, d))


# ----------------------------------------------------------------------------
# Full Transformer forward (Pallas)
# ----------------------------------------------------------------------------
def transformer_forward(x, params, mask=None, *, heads, dim_head, causal=False):
    b, n, _ = x.shape
    if mask is None:
        mask = jnp.ones((b, n), dtype=bool)
    neg = -jnp.finfo(jnp.float32).max
    # key-padding mask as a precomputed additive f32 bias (0 / -max), (b, 1, n)
    mask_bias = jnp.where(mask, 0.0, neg).astype(jnp.float32).reshape(b, 1, n)

    layers = params["layers"]
    depth = len(layers)
    if depth == 0:
        return layernorm(layernorm(x, params["norm_in_g"]), params["norm_out_g"])

    for li, layer_p in enumerate(layers):
        x = transformer_layer(
            x, mask_bias, layer_p,
            params["norm_in_g"], params["norm_out_g"],
            heads=heads, dim_head=dim_head, causal=causal,
            fuse_norm_in=(li == 0), fuse_norm_out=(li == depth - 1))
    return x


# ----------------------------------------------------------------------------
# Deterministic parameter init (shapes mirror the torch module's __init__)
# ----------------------------------------------------------------------------
def init_params(key, dim, depth, dim_head, heads, ff_mult):
    inner = dim_head * heads
    ff_inner = int(dim * ff_mult)
    keys = jax.random.split(key, max(depth * 4, 1))

    def lin(k, fan_in, fan_out):
        bound = 1.0 / math.sqrt(fan_in)     # torch nn.Linear default init
        return jax.random.uniform(k, (fan_in, fan_out), jnp.float32, -bound, bound)

    layers = []
    ki = 0
    for _ in range(depth):
        layers.append(dict(
            ln1_g=jnp.ones((dim,), jnp.float32),
            w_qkv=lin(keys[ki + 0], dim, 3 * inner),
            w_out=lin(keys[ki + 1], inner, dim),
            out_ln_g=jnp.ones((dim,), jnp.float32),
            ln2_g=jnp.ones((dim,), jnp.float32),
            w_ff1=lin(keys[ki + 2], dim, 2 * ff_inner),
            ffln_g=jnp.ones((ff_inner,), jnp.float32),
            w_ff2=lin(keys[ki + 3], ff_inner, dim),
        ))
        ki += 4
    return dict(norm_in_g=jnp.ones((dim,), jnp.float32),
                norm_out_g=jnp.ones((dim,), jnp.float32),
                layers=layers)


# ----------------------------------------------------------------------------
# Pure-JAX f32 reference (mirrors the torch forward) for a correctness check
# ----------------------------------------------------------------------------
def reference_forward(x, params, mask, *, heads, dim_head, causal=False):
    neg = -jnp.finfo(jnp.float32).max
    scale = dim_head ** (-0.5)
    b, n, d = x.shape
    x = _layernorm(x, params["norm_in_g"])
    for p in params["layers"]:
        xn = _layernorm(x, p["ln1_g"])
        qkv = xn @ p["w_qkv"]
        q, k, v = jnp.split(qkv, 3, axis=-1)
        to_heads = lambda t: t.reshape(b, n, heads, dim_head).transpose(0, 2, 1, 3)
        q, k, v = map(to_heads, (q, k, v))
        q = q * scale
        sim = jnp.einsum('bhid,bhjd->bhij', q, k)
        sim = jnp.where(mask[:, None, None, :], sim, neg)
        if causal:
            cm = jnp.triu(jnp.ones((n, n), bool), 1)
            sim = jnp.where(cm, neg, sim)
        attn = jax.nn.softmax(sim, axis=-1)
        out = jnp.einsum('bhij,bhjd->bhid', attn, v)
        out = out.transpose(0, 2, 1, 3).reshape(b, n, heads * dim_head)
        out = _layernorm(out @ p["w_out"], p["out_ln_g"])
        x = x + out
        xn2 = _layernorm(x, p["ln2_g"])
        h1 = xn2 @ p["w_ff1"]
        a, gate = jnp.split(h1, 2, axis=-1)
        gg = a * (0.5 * gate * (1.0 + lax.erf(gate / SQRT2)))
        gg = _layernorm(gg, p["ffln_g"])
        x = x + gg @ p["w_ff2"]
    return _layernorm(x, params["norm_out_g"])


if __name__ == "__main__":
    dim, depth, heads, dim_head, ff_mult = 32, 2, 2, 16, 4
    batch, seq = 2, 8
    causal = False

    key = jax.random.PRNGKey(0)
    kx, kp = jax.random.split(key)
    x = jax.random.normal(kx, (batch, seq, dim), jnp.float32)
    # key-padding mask: last two tokens of every sequence are padding
    mask = jnp.ones((batch, seq), dtype=bool).at[:, -2:].set(False)

    params = init_params(kp, dim, depth, dim_head, heads, ff_mult)

    out = transformer_forward(x, params, mask, heads=heads,
                              dim_head=dim_head, causal=causal)
    out = jax.block_until_ready(out)

    ref = reference_forward(x, params, mask, heads=heads,
                            dim_head=dim_head, causal=causal)
    assert out.shape == (batch, seq, dim)
    # Tolerance accounts for bf16 MXU operands + approx softmax reciprocal in
    # the kernel vs the pure-f32 reference (LN/softmax stats stay f32).
    assert jnp.allclose(out, ref, atol=3e-2, rtol=3e-2), "mismatch vs JAX reference"
    print("KERNEL_OK")
</pallas_src>

<mosaic_0001>
module attributes {stable_mosaic.version = 11 : i64} {
  func.func @transformer_layer_kernel(%arg0: i32, %arg1: memref<1x8x32xf32, #tpu.memory_space<vmem>>, %arg2: memref<1x1x8xf32, #tpu.memory_space<vmem>>, %arg3: memref<1x32xf32, #tpu.memory_space<vmem>>, %arg4: memref<1x32xf32, #tpu.memory_space<vmem>>, %arg5: memref<32x96xbf16, #tpu.memory_space<vmem>>, %arg6: memref<32x32xbf16, #tpu.memory_space<vmem>>, %arg7: memref<1x32xf32, #tpu.memory_space<vmem>>, %arg8: memref<1x32xf32, #tpu.memory_space<vmem>>, %arg9: memref<32x256xbf16, #tpu.memory_space<vmem>>, %arg10: memref<1x128xf32, #tpu.memory_space<vmem>>, %arg11: memref<128x32xbf16, #tpu.memory_space<vmem>>, %arg12: memref<1x32xf32, #tpu.memory_space<vmem>>, %arg13: memref<1x8x32xf32, #tpu.memory_space<vmem>>) attributes {dimension_semantics = [#tpu.dimension_semantics<parallel>], iteration_bounds = array<i64: 2>, scalar_prefetch = 0 : i64, scratch_operands = 0 : i64, tpu.core_type = #tpu.core_type<tc>, window_params = [{transform_indices = @transform_0, window_bounds = array<i64: 1, 8, 32>}, {transform_indices = @transform_1, window_bounds = array<i64: 1, 1, 8>}, {pipeline_mode = #tpu.pipeline_mode<synchronous>, transform_indices = @transform_2, window_bounds = array<i64: 1, 32>}, {pipeline_mode = #tpu.pipeline_mode<synchronous>, transform_indices = @transform_3, window_bounds = array<i64: 1, 32>}, {pipeline_mode = #tpu.pipeline_mode<synchronous>, transform_indices = @transform_4, window_bounds = array<i64: 32, 96>}, {pipeline_mode = #tpu.pipeline_mode<synchronous>, transform_indices = @transform_5, window_bounds = array<i64: 32, 32>}, {pipeline_mode = #tpu.pipeline_mode<synchronous>, transform_indices = @transform_6, window_bounds = array<i64: 1, 32>}, {pipeline_mode = #tpu.pipeline_mode<synchronous>, transform_indices = @transform_7, window_bounds = array<i64: 1, 32>}, {pipeline_mode = #tpu.pipeline_mode<synchronous>, transform_indices = @transform_8, window_bounds = array<i64: 32, 256>}, {pipeline_mode = #tpu.pipeline_mode<synchronous>, transform_indices = @transform_9, window_bounds = array<i64: 1, 128>}, {pipeline_mode = #tpu.pipeline_mode<synchronous>, transform_indices = @transform_10, window_bounds = array<i64: 128, 32>}, {pipeline_mode = #tpu.pipeline_mode<synchronous>, transform_indices = @transform_11, window_bounds = array<i64: 1, 32>}, {transform_indices = @transform_12, window_bounds = array<i64: 1, 8, 32>}]} {
    %c0 = arith.constant 0 : index
    %c0_0 = arith.constant 0 : index
    %c0_1 = arith.constant 0 : index
    %0 = vector.load %arg1[%c0, %c0_0, %c0_1] : memref<1x8x32xf32, #tpu.memory_space<vmem>>, vector<1x8x32xf32>
    %1 = vector.shape_cast %0 : vector<1x8x32xf32> to vector<8x32xf32>
    %c0_2 = arith.constant 0 : index
    %c0_3 = arith.constant 0 : index
    %2 = vector.load %arg3[%c0_2, %c0_3] : memref<1x32xf32, #tpu.memory_space<vmem>>, vector<1x32xf32>
    %cst = arith.constant dense<0.000000e+00> : vector<8xf32>
    %3 = vector.multi_reduction <add>, %1, %cst [1] : vector<8x32xf32> to vector<8xf32>
    %4 = vector.shape_cast %3 : vector<8xf32> to vector<8x1xf32>
    %cst_4 = arith.constant 3.200000e+01 : f32
    %5 = vector.broadcast %cst_4 : f32 to vector<8x1xf32>
    %6 = arith.divf %4, %5 : vector<8x1xf32>
    %7 = vector.broadcast %6 : vector<8x1xf32> to vector<8x32xf32>
    %8 = arith.subf %1, %7 : vector<8x32xf32>
    %9 = arith.mulf %8, %8 : vector<8x32xf32>
    %cst_5 = arith.constant dense<0.000000e+00> : vector<8xf32>
    %10 = vector.multi_reduction <add>, %9, %cst_5 [1] : vector<8x32xf32> to vector<8xf32>
    %11 = vector.shape_cast %10 : vector<8xf32> to vector<8x1xf32>
    %cst_6 = arith.constant 3.200000e+01 : f32
    %12 = vector.broadcast %cst_6 : f32 to vector<8x1xf32>
    %13 = arith.divf %11, %12 : vector<8x1xf32>
    %14 = vector.broadcast %6 : vector<8x1xf32> to vector<8x32xf32>
    %15 = arith.subf %1, %14 : vector<8x32xf32>
    %cst_7 = arith.constant 9.99999974E-6 : f32
    %16 = vector.broadcast %cst_7 : f32 to vector<8x1xf32>
    %17 = arith.addf %13, %16 : vector<8x1xf32>
    %18 = math.rsqrt %17 : vector<8x1xf32>
    %19 = vector.broadcast %18 : vector<8x1xf32> to vector<8x32xf32>
    %20 = arith.mulf %15, %19 : vector<8x32xf32>
    %21 = vector.broadcast %2 : vector<1x32xf32> to vector<8x32xf32>
    %22 = arith.mulf %20, %21 : vector<8x32xf32>
    %c0_8 = arith.constant 0 : index
    %c0_9 = arith.constant 0 : index
    %c0_10 = arith.constant 0 : index
    %23 = vector.load %arg2[%c0_8, %c0_9, %c0_10] : memref<1x1x8xf32, #tpu.memory_space<vmem>>, vector<1x1x8xf32>
    %24 = vector.shape_cast %23 : vector<1x1x8xf32> to vector<1x8xf32>
    %c0_11 = arith.constant 0 : index
    %c0_12 = arith.constant 0 : index
    %25 = vector.load %arg4[%c0_11, %c0_12] : memref<1x32xf32, #tpu.memory_space<vmem>>, vector<1x32xf32>
    %cst_13 = arith.constant dense<0.000000e+00> : vector<8xf32>
    %26 = vector.multi_reduction <add>, %22, %cst_13 [1] : vector<8x32xf32> to vector<8xf32>
    %27 = vector.shape_cast %26 : vector<8xf32> to vector<8x1xf32>
    %cst_14 = arith.constant 3.200000e+01 : f32
    %28 = vector.broadcast %cst_14 : f32 to vector<8x1xf32>
    %29 = arith.divf %27, %28 : vector<8x1xf32>
    %30 = vector.broadcast %29 : vector<8x1xf32> to vector<8x32xf32>
    %31 = arith.subf %22, %30 : vector<8x32xf32>
    %32 = arith.mulf %31, %31 : vector<8x32xf32>
    %cst_15 = arith.constant dense<0.000000e+00> : vector<8xf32>
    %33 = vector.multi_reduction <add>, %32, %cst_15 [1] : vector<8x32xf32> to vector<8xf32>
    %34 = vector.shape_cast %33 : vector<8xf32> to vector<8x1xf32>
    %cst_16 = arith.constant 3.200000e+01 : f32
    %35 = vector.broadcast %cst_16 : f32 to vector<8x1xf32>
    %36 = arith.divf %34, %35 : vector<8x1xf32>
    %37 = vector.broadcast %29 : vector<8x1xf32> to vector<8x32xf32>
    %38 = arith.subf %22, %37 : vector<8x32xf32>
    %cst_17 = arith.constant 9.99999974E-6 : f32
    %39 = vector.broadcast %cst_17 : f32 to vector<8x1xf32>
    %40 = arith.addf %36, %39 : vector<8x1xf32>
    %41 = math.rsqrt %40 : vector<8x1xf32>
    %42 = vector.broadcast %41 : vector<8x1xf32> to vector<8x32xf32>
    %43 = arith.mulf %38, %42 : vector<8x32xf32>
    %44 = vector.broadcast %25 : vector<1x32xf32> to vector<8x32xf32>
    %45 = arith.mulf %43, %44 : vector<8x32xf32>
    %46 = arith.truncf %45 : vector<8x32xf32> to vector<8x32xbf16>
    %c0_18 = arith.constant 0 : index
    %c0_19 = arith.constant 0 : index
    %47 = vector.load %arg5[%c0_18, %c0_19] : memref<32x96xbf16, #tpu.memory_space<vmem>>, vector<32x96xbf16>
    %cst_20 = arith.constant dense<0.000000e+00> : vector<8x96xf32>
    %48 = tpu.matmul %46, %47, %cst_20 {dimension_numbers = #tpu.dot_dimension_numbers<[1], [0], [0], [1], [0, 0, 1, 1], [], []>} : vector<8x32xbf16>, vector<32x96xbf16>, vector<8x96xf32> -> vector<8x96xf32>
    %cst_21 = arith.constant 0.000000e+00 : f32
    %49 = vector.broadcast %cst_21 : f32 to vector<8x32xf32>
    %50 = vector.extract_strided_slice %48 {offsets = [0, 0], sizes = [8, 16], strides = [1, 1]} : vector<8x96xf32> to vector<8x16xf32>
    %cst_22 = arith.constant 2.500000e-01 : f32
    %51 = vector.broadcast %cst_22 : f32 to vector<8x16xf32>
    %52 = arith.mulf %50, %51 : vector<8x16xf32>
    %53 = arith.truncf %52 : vector<8x16xf32> to vector<8x16xbf16>
    %54 = vector.extract_strided_slice %48 {offsets = [0, 32], sizes = [8, 16], strides = [1, 1]} : vector<8x96xf32> to vector<8x16xf32>
    %55 = arith.truncf %54 : vector<8x16xf32> to vector<8x16xbf16>
    %56 = vector.extract_strided_slice %48 {offsets = [0, 64], sizes = [8, 16], strides = [1, 1]} : vector<8x96xf32> to vector<8x16xf32>
    %57 = arith.truncf %56 : vector<8x16xf32> to vector<8x16xbf16>
    %cst_23 = arith.constant dense<0.000000e+00> : vector<8x8xf32>
    %58 = tpu.matmul %53, %55, %cst_23 {dimension_numbers = #tpu.dot_dimension_numbers<[1], [1], [0], [0], [0, 0, 1, 0], [], []>} : vector<8x16xbf16>, vector<8x16xbf16>, vector<8x8xf32> -> vector<8x8xf32>
    %59 = vector.broadcast %24 : vector<1x8xf32> to vector<8x8xf32>
    %60 = arith.addf %58, %59 : vector<8x8xf32>
    %cst_24 = arith.constant dense<0xFF800000> : vector<8xf32>
    %61 = vector.multi_reduction <maximumf>, %60, %cst_24 [1] : vector<8x8xf32> to vector<8xf32>
    %62 = vector.shape_cast %61 : vector<8xf32> to vector<8x1xf32>
    %63 = vector.broadcast %62 : vector<8x1xf32> to vector<8x8xf32>
    %64 = arith.subf %60, %63 : vector<8x8xf32>
    %65 = math.exp %64 : vector<8x8xf32>
    %cst_25 = arith.constant dense<0.000000e+00> : vector<8xf32>
    %66 = vector.multi_reduction <add>, %65, %cst_25 [1] : vector<8x8xf32> to vector<8xf32>
    %67 = vector.shape_cast %66 : vector<8xf32> to vector<8x1xf32>
    %68 = tpu.reciprocal %67 {approx = true} : vector<8x1xf32> -> vector<8x1xf32>
    %69 = vector.broadcast %68 : vector<8x1xf32> to vector<8x8xf32>
    %70 = arith.mulf %65, %69 : vector<8x8xf32>
    %71 = arith.truncf %70 : vector<8x8xf32> to vector<8x8xbf16>
    %cst_26 = arith.constant dense<0.000000e+00> : vector<8x16xf32>
    %72 = tpu.matmul %71, %57, %cst_26 {dimension_numbers = #tpu.dot_dimension_numbers<[1], [0], [0], [1], [0, 0, 1, 1], [], []>} : vector<8x8xbf16>, vector<8x16xbf16>, vector<8x16xf32> -> vector<8x16xf32>
    %73 = arith.truncf %72 : vector<8x16xf32> to vector<8x16xbf16>
    %c0_27 = arith.constant 0 : index
    %c0_28 = arith.constant 0 : index
    %74 = vector.load %arg6[%c0_27, %c0_28] : memref<32x32xbf16, #tpu.memory_space<vmem>>, vector<16x32xbf16>
    %cst_29 = arith.constant dense<0.000000e+00> : vector<8x32xf32>
    %75 = tpu.matmul %73, %74, %cst_29 {dimension_numbers = #tpu.dot_dimension_numbers<[1], [0], [0], [1], [0, 0, 1, 1], [], []>} : vector<8x16xbf16>, vector<16x32xbf16>, vector<8x32xf32> -> vector<8x32xf32>
    %76 = arith.addf %49, %75 : vector<8x32xf32>
    %77 = vector.extract_strided_slice %48 {offsets = [0, 16], sizes = [8, 16], strides = [1, 1]} : vector<8x96xf32> to vector<8x16xf32>
    %cst_30 = arith.constant 2.500000e-01 : f32
    %78 = vector.broadcast %cst_30 : f32 to vector<8x16xf32>
    %79 = arith.mulf %77, %78 : vector<8x16xf32>
    %80 = arith.truncf %79 : vector<8x16xf32> to vector<8x16xbf16>
    %81 = vector.extract_strided_slice %48 {offsets = [0, 48], sizes = [8, 16], strides = [1, 1]} : vector<8x96xf32> to vector<8x16xf32>
    %82 = arith.truncf %81 : vector<8x16xf32> to vector<8x16xbf16>
    %83 = vector.extract_strided_slice %48 {offsets = [0, 80], sizes = [8, 16], strides = [1, 1]} : vector<8x96xf32> to vector<8x16xf32>
    %84 = arith.truncf %83 : vector<8x16xf32> to vector<8x16xbf16>
    %cst_31 = arith.constant dense<0.000000e+00> : vector<8x8xf32>
    %85 = tpu.matmul %80, %82, %cst_31 {dimension_numbers = #tpu.dot_dimension_numbers<[1], [1], [0], [0], [0, 0, 1, 0], [], []>} : vector<8x16xbf16>, vector<8x16xbf16>, vector<8x8xf32> -> vector<8x8xf32>
    %86 = vector.broadcast %24 : vector<1x8xf32> to vector<8x8xf32>
    %87 = arith.addf %85, %86 : vector<8x8xf32>
    %cst_32 = arith.constant dense<0xFF800000> : vector<8xf32>
    %88 = vector.multi_reduction <maximumf>, %87, %cst_32 [1] : vector<8x8xf32> to vector<8xf32>
    %89 = vector.shape_cast %88 : vector<8xf32> to vector<8x1xf32>
    %90 = vector.broadcast %89 : vector<8x1xf32> to vector<8x8xf32>
    %91 = arith.subf %87, %90 : vector<8x8xf32>
    %92 = math.exp %91 : vector<8x8xf32>
    %cst_33 = arith.constant dense<0.000000e+00> : vector<8xf32>
    %93 = vector.multi_reduction <add>, %92, %cst_33 [1] : vector<8x8xf32> to vector<8xf32>
    %94 = vector.shape_cast %93 : vector<8xf32> to vector<8x1xf32>
    %95 = tpu.reciprocal %94 {approx = true} : vector<8x1xf32> -> vector<8x1xf32>
    %96 = vector.broadcast %95 : vector<8x1xf32> to vector<8x8xf32>
    %97 = arith.mulf %92, %96 : vector<8x8xf32>
    %98 = arith.truncf %97 : vector<8x8xf32> to vector<8x8xbf16>
    %cst_34 = arith.constant dense<0.000000e+00> : vector<8x16xf32>
    %99 = tpu.matmul %98, %84, %cst_34 {dimension_numbers = #tpu.dot_dimension_numbers<[1], [0], [0], [1], [0, 0, 1, 1], [], []>} : vector<8x8xbf16>, vector<8x16xbf16>, vector<8x16xf32> -> vector<8x16xf32>
    %100 = arith.truncf %99 : vector<8x16xf32> to vector<8x16xbf16>
    %c16 = arith.constant 16 : index
    %c0_35 = arith.constant 0 : index
    %101 = vector.load %arg6[%c16, %c0_35] : memref<32x32xbf16, #tpu.memory_space<vmem>>, vector<16x32xbf16>
    %cst_36 = arith.constant dense<0.000000e+00> : vector<8x32xf32>
    %102 = tpu.matmul %100, %101, %cst_36 {dimension_numbers = #tpu.dot_dimension_numbers<[1], [0], [0], [1], [0, 0, 1, 1], [], []>} : vector<8x16xbf16>, vector<16x32xbf16>, vector<8x32xf32> -> vector<8x32xf32>
    %103 = arith.addf %76, %102 : vector<8x32xf32>
    %c0_37 = arith.constant 0 : index
    %c0_38 = arith.constant 0 : index
    %104 = vector.load %arg7[%c0_37, %c0_38] : memref<1x32xf32, #tpu.memory_space<vmem>>, vector<1x32xf32>
    %cst_39 = arith.constant dense<0.000000e+00> : vector<8xf32>
    %105 = vector.multi_reduction <add>, %103, %cst_39 [1] : vector<8x32xf32> to vector<8xf32>
    %106 = vector.shape_cast %105 : vector<8xf32> to vector<8x1xf32>
    %cst_40 = arith.constant 3.200000e+01 : f32
    %107 = vector.broadcast %cst_40 : f32 to vector<8x1xf32>
    %108 = arith.divf %106, %107 : vector<8x1xf32>
    %109 = vector.broadcast %108 : vector<8x1xf32> to vector<8x32xf32>
    %110 = arith.subf %103, %109 : vector<8x32xf32>
    %111 = arith.mulf %110, %110 : vector<8x32xf32>
    %cst_41 = arith.constant dense<0.000000e+00> : vector<8xf32>
    %112 = vector.multi_reduction <add>, %111, %cst_41 [1] : vector<8x32xf32> to vector<8xf32>
    %113 = vector.shape_cast %112 : vector<8xf32> to vector<8x1xf32>
    %cst_42 = arith.constant 3.200000e+01 : f32
    %114 = vector.broadcast %cst_42 : f32 to vector<8x1xf32>
    %115 = arith.divf %113, %114 : vector<8x1xf32>
    %116 = vector.broadcast %108 : vector<8x1xf32> to vector<8x32xf32>
    %117 = arith.subf %103, %116 : vector<8x32xf32>
    %cst_43 = arith.constant 9.99999974E-6 : f32
    %118 = vector.broadcast %cst_43 : f32 to vector<8x1xf32>
    %119 = arith.addf %115, %118 : vector<8x1xf32>
    %120 = math.rsqrt %119 : vector<8x1xf32>
    %121 = vector.broadcast %120 : vector<8x1xf32> to vector<8x32xf32>
    %122 = arith.mulf %117, %121 : vector<8x32xf32>
    %123 = vector.broadcast %104 : vector<1x32xf32> to vector<8x32xf32>
    %124 = arith.mulf %122, %123 : vector<8x32xf32>
    %125 = arith.addf %22, %124 : vector<8x32xf32>
    %c0_44 = arith.constant 0 : index
    %c0_45 = arith.constant 0 : index
    %126 = vector.load %arg8[%c0_44, %c0_45] : memref<1x32xf32, #tpu.memory_space<vmem>>, vector<1x32xf32>
    %cst_46 = arith.constant dense<0.000000e+00> : vector<8xf32>
    %127 = vector.multi_reduction <add>, %125, %cst_46 [1] : vector<8x32xf32> to vector<8xf32>
    %128 = vector.shape_cast %127 : vector<8xf32> to vector<8x1xf32>
    %cst_47 = arith.constant 3.200000e+01 : f32
    %129 = vector.broadcast %cst_47 : f32 to vector<8x1xf32>
    %130 = arith.divf %128, %129 : vector<8x1xf32>
    %131 = vector.broadcast %130 : vector<8x1xf32> to vector<8x32xf32>
    %132 = arith.subf %125, %131 : vector<8x32xf32>
    %133 = arith.mulf %132, %132 : vector<8x32xf32>
    %cst_48 = arith.constant dense<0.000000e+00> : vector<8xf32>
    %134 = vector.multi_reduction <add>, %133, %cst_48 [1] : vector<8x32xf32> to vector<8xf32>
    %135 = vector.shape_cast %134 : vector<8xf32> to vector<8x1xf32>
    %cst_49 = arith.constant 3.200000e+01 : f32
    %136 = vector.broadcast %cst_49 : f32 to vector<8x1xf32>
    %137 = arith.divf %135, %136 : vector<8x1xf32>
    %138 = vector.broadcast %130 : vector<8x1xf32> to vector<8x32xf32>
    %139 = arith.subf %125, %138 : vector<8x32xf32>
    %cst_50 = arith.constant 9.99999974E-6 : f32
    %140 = vector.broadcast %cst_50 : f32 to vector<8x1xf32>
    %141 = arith.addf %137, %140 : vector<8x1xf32>
    %142 = math.rsqrt %141 : vector<8x1xf32>
    %143 = vector.broadcast %142 : vector<8x1xf32> to vector<8x32xf32>
    %144 = arith.mulf %139, %143 : vector<8x32xf32>
    %145 = vector.broadcast %126 : vector<1x32xf32> to vector<8x32xf32>
    %146 = arith.mulf %144, %145 : vector<8x32xf32>
    %147 = arith.truncf %146 : vector<8x32xf32> to vector<8x32xbf16>
    %c0_51 = arith.constant 0 : index
    %c0_52 = arith.constant 0 : index
    %148 = vector.load %arg9[%c0_51, %c0_52] : memref<32x256xbf16, #tpu.memory_space<vmem>>, vector<32x256xbf16>
    %cst_53 = arith.constant dense<0.000000e+00> : vector<8x256xf32>
    %149 = tpu.matmul %147, %148, %cst_53 {dimension_numbers = #tpu.dot_dimension_numbers<[1], [0], [0], [1], [0, 0, 1, 1], [], []>} : vector<8x32xbf16>, vector<32x256xbf16>, vector<8x256xf32> -> vector<8x256xf32>
    %150 = vector.extract_strided_slice %149 {offsets = [0, 0], sizes = [8, 128], strides = [1, 1]} : vector<8x256xf32> to vector<8x128xf32>
    %151 = vector.extract_strided_slice %149 {offsets = [0, 128], sizes = [8, 128], strides = [1, 1]} : vector<8x256xf32> to vector<8x128xf32>
    %cst_54 = arith.constant 5.000000e-01 : f32
    %152 = vector.broadcast %cst_54 : f32 to vector<8x128xf32>
    %153 = arith.mulf %152, %151 : vector<8x128xf32>
    %cst_55 = arith.constant 1.41421354 : f32
    %154 = vector.broadcast %cst_55 : f32 to vector<8x128xf32>
    %155 = arith.divf %151, %154 : vector<8x128xf32>
    %156 = math.erf %155 : vector<8x128xf32>
    %cst_56 = arith.constant 1.000000e+00 : f32
    %157 = vector.broadcast %cst_56 : f32 to vector<8x128xf32>
    %158 = arith.addf %157, %156 : vector<8x128xf32>
    %159 = arith.mulf %153, %158 : vector<8x128xf32>
    %160 = arith.mulf %150, %159 : vector<8x128xf32>
    %c0_57 = arith.constant 0 : index
    %c0_58 = arith.constant 0 : index
    %161 = vector.load %arg10[%c0_57, %c0_58] : memref<1x128xf32, #tpu.memory_space<vmem>>, vector<1x128xf32>
    %cst_59 = arith.constant dense<0.000000e+00> : vector<8xf32>
    %162 = vector.multi_reduction <add>, %160, %cst_59 [1] : vector<8x128xf32> to vector<8xf32>
    %163 = vector.shape_cast %162 : vector<8xf32> to vector<8x1xf32>
    %cst_60 = arith.constant 1.280000e+02 : f32
    %164 = vector.broadcast %cst_60 : f32 to vector<8x1xf32>
    %165 = arith.divf %163, %164 : vector<8x1xf32>
    %166 = vector.broadcast %165 : vector<8x1xf32> to vector<8x128xf32>
    %167 = arith.subf %160, %166 : vector<8x128xf32>
    %168 = arith.mulf %167, %167 : vector<8x128xf32>
    %cst_61 = arith.constant dense<0.000000e+00> : vector<8xf32>
    %169 = vector.multi_reduction <add>, %168, %cst_61 [1] : vector<8x128xf32> to vector<8xf32>
    %170 = vector.shape_cast %169 : vector<8xf32> to vector<8x1xf32>
    %cst_62 = arith.constant 1.280000e+02 : f32
    %171 = vector.broadcast %cst_62 : f32 to vector<8x1xf32>
    %172 = arith.divf %170, %171 : vector<8x1xf32>
    %173 = vector.broadcast %165 : vector<8x1xf32> to vector<8x128xf32>
    %174 = arith.subf %160, %173 : vector<8x128xf32>
    %cst_63 = arith.constant 9.99999974E-6 : f32
    %175 = vector.broadcast %cst_63 : f32 to vector<8x1xf32>
    %176 = arith.addf %172, %175 : vector<8x1xf32>
    %177 = math.rsqrt %176 : vector<8x1xf32>
    %178 = vector.broadcast %177 : vector<8x1xf32> to vector<8x128xf32>
    %179 = arith.mulf %174, %178 : vector<8x128xf32>
    %180 = vector.broadcast %161 : vector<1x128xf32> to vector<8x128xf32>
    %181 = arith.mulf %179, %180 : vector<8x128xf32>
    %182 = arith.truncf %181 : vector<8x128xf32> to vector<8x128xbf16>
    %c0_64 = arith.constant 0 : index
    %c0_65 = arith.constant 0 : index
    %183 = vector.load %arg11[%c0_64, %c0_65] : memref<128x32xbf16, #tpu.memory_space<vmem>>, vector<128x32xbf16>
    %cst_66 = arith.constant dense<0.000000e+00> : vector<8x32xf32>
    %184 = tpu.matmul %182, %183, %cst_66 {dimension_numbers = #tpu.dot_dimension_numbers<[1], [0], [0], [1], [0, 0, 1, 1], [], []>} : vector<8x128xbf16>, vector<128x32xbf16>, vector<8x32xf32> -> vector<8x32xf32>
    %185 = arith.addf %125, %184 : vector<8x32xf32>
    %c0_67 = arith.constant 0 : index
    %c0_68 = arith.constant 0 : index
    %c0_69 = arith.constant 0 : index
    %186 = vector.load %arg13[%c0_67, %c0_68, %c0_69] : memref<1x8x32xf32, #tpu.memory_space<vmem>>, vector<1x8x32xf32>
    %187 = vector.shape_cast %186 : vector<1x8x32xf32> to vector<8x32xf32>
    %188 = vector.shape_cast %185 : vector<8x32xf32> to vector<1x8x32xf32>
    tpu.vector_store %arg13[%c0_67, %c0_68, %c0_69], %188 {strides = array<i32>} : memref<1x8x32xf32, #tpu.memory_space<vmem>>, vector<1x8x32xf32>,
    return
  }
  func.func @transform_0(%arg0: i32) -> (i32, i32, i32) {
    %c0_i32 = arith.constant 0 : i32
    %c0_i32_0 = arith.constant 0 : i32
    %c0_i32_1 = arith.constant 0 : i32
    return %arg0, %c0_i32, %c0_i32_0 : i32, i32, i32
  }
  func.func @transform_1(%arg0: i32) -> (i32, i32, i32) {
    %c0_i32 = arith.constant 0 : i32
    %c0_i32_0 = arith.constant 0 : i32
    %c0_i32_1 = arith.constant 0 : i32
    return %arg0, %c0_i32, %c0_i32_0 : i32, i32, i32
  }
  func.func @transform_2(%arg0: i32) -> (i32, i32) {
    %c0_i32 = arith.constant 0 : i32
    %c0_i32_0 = arith.constant 0 : i32
    %c0_i32_1 = arith.constant 0 : i32
    return %c0_i32, %c0_i32_0 : i32, i32
  }
  func.func @transform_3(%arg0: i32) -> (i32, i32) {
    %c0_i32 = arith.constant 0 : i32
    %c0_i32_0 = arith.constant 0 : i32
    %c0_i32_1 = arith.constant 0 : i32
    return %c0_i32, %c0_i32_0 : i32, i32
  }
  func.func @transform_4(%arg0: i32) -> (i32, i32) {
    %c0_i32 = arith.constant 0 : i32
    %c0_i32_0 = arith.constant 0 : i32
    %c0_i32_1 = arith.constant 0 : i32
    return %c0_i32, %c0_i32_0 : i32, i32
  }
  func.func @transform_5(%arg0: i32) -> (i32, i32) {
    %c0_i32 = arith.constant 0 : i32
    %c0_i32_0 = arith.constant 0 : i32
    %c0_i32_1 = arith.constant 0 : i32
    return %c0_i32, %c0_i32_0 : i32, i32
  }
  func.func @transform_6(%arg0: i32) -> (i32, i32) {
    %c0_i32 = arith.constant 0 : i32
    %c0_i32_0 = arith.constant 0 : i32
    %c0_i32_1 = arith.constant 0 : i32
    return %c0_i32, %c0_i32_0 : i32, i32
  }
  func.func @transform_7(%arg0: i32) -> (i32, i32) {
    %c0_i32 = arith.constant 0 : i32
    %c0_i32_0 = arith.constant 0 : i32
    %c0_i32_1 = arith.constant 0 : i32
    return %c0_i32, %c0_i32_0 : i32, i32
  }
  func.func @transform_8(%arg0: i32) -> (i32, i32) {
    %c0_i32 = arith.constant 0 : i32
    %c0_i32_0 = arith.constant 0 : i32
    %c0_i32_1 = arith.constant 0 : i32
    return %c0_i32, %c0_i32_0 : i32, i32
  }
  func.func @transform_9(%arg0: i32) -> (i32, i32) {
    %c0_i32 = arith.constant 0 : i32
    %c0_i32_0 = arith.constant 0 : i32
    %c0_i32_1 = arith.constant 0 : i32
    return %c0_i32, %c0_i32_0 : i32, i32
  }
  func.func @transform_10(%arg0: i32) -> (i32, i32) {
    %c0_i32 = arith.constant 0 : i32
    %c0_i32_0 = arith.constant 0 : i32
    %c0_i32_1 = arith.constant 0 : i32
    return %c0_i32, %c0_i32_0 : i32, i32
  }
  func.func @transform_11(%arg0: i32) -> (i32, i32) {
    %c0_i32 = arith.constant 0 : i32
    %c0_i32_0 = arith.constant 0 : i32
    %c0_i32_1 = arith.constant 0 : i32
    return %c0_i32, %c0_i32_0 : i32, i32
  }
  func.func @transform_12(%arg0: i32) -> (i32, i32, i32) {
    %c0_i32 = arith.constant 0 : i32
    %c0_i32_0 = arith.constant 0 : i32
    %c0_i32_1 = arith.constant 0 : i32
    return %arg0, %c0_i32, %c0_i32_0 : i32, i32, i32
  }
}

</mosaic_0001>

<bundles_post_ra>
// kernel: tpu_custom_call.1
= control target key start
LH: loop header
LB: loop body
LE: loop exit
PB: predicated region body
PF: predicated region fallthrough
CT: control target
= control target key end

     0   :  { %s2140_s0 = inlined_call_operand.vmem [shape: f32[2,8,32], index: 0, kind: input, shape index: {}]   ;;  %s2141_s1 = inlined_call_operand.hbm [shape: f32[2,1,8], index: 1, kind: input, shape index: {}]   ;;  %s2142_s2 = inlined_call_operand.vmem [shape: f32[1,32], index: 2, kind: input, shape index: {}]   ;;  %s2143_s3 = inlined_call_operand.vmem [shape: f32[1,32], index: 3, kind: input, shape index: {}]   ;;  %s2144_s4 = inlined_call_operand.vmem [shape: bf16[32,96], index: 4, kind: input, shape index: {}]   ;;  %s2145_s5 = inlined_call_operand.vmem [shape: bf16[32,32], index: 5, kind: input, shape index: {}]   ;;  %s2146_s6 = inlined_call_operand.hbm [shape: f32[1,32], index: 6, kind: input, shape index: {}]   ;;  %s2147_s7 = inlined_call_operand.hbm [shape: f32[1,32], index: 7, kind: input, shape index: {}]   ;;  %s2148_s8 = inlined_call_operand.vmem [shape: bf16[32,256], index: 8, kind: input, shape index: {}]   ;;  %s2149_s9 = inlined_call_operand.hbm [shape: f32[1,128], index: 9, kind: input, shape index: {}]   ;;  %s2150_s10 = inlined_call_operand.vmem [shape: bf16[128,32], index: 10, kind: input, shape index: {}]   ;;  %s2151_s11 = inlined_call_operand.vmem [shape: f32[1,32], index: 11, kind: input, shape index: {}]   ;;  %s2152_s12 = inlined_call_operand.hbm [shape: f32[2,8,32], index: 12, kind: output, shape index: {}]  }
   0x1   :  { %2160 = sst [smem:[#allocation18_spill]] %s2146_s6 }
   0x2   :  { %2161 = sst [smem:[#allocation19_spill]] %s2147_s7 }
   0x3   :  { %2162 = sst [smem:[#allocation20_spill]] %s2149_s9 }
   0x4   :  { %17 = vsyncpa [#allocation3], 0 }
   0x5   :  { %19 = vsyncpa [#allocation3 + $0x1], 0 }
   0x6   :  { %20 = vsyncpa [#allocation6], 0 }
   0x7   :  { %21 = vsyncpa [#allocation9], 0 }
   0x8   :  { %22 = vsyncpa [#allocation4], 0 }
   0x9   :  { %24 = vsyncpa [#allocation4 + $0x1], 0  ;;  %s1808_s21 = smov 0   ;;  %s1810_s22 = smov 0  }
   0xa   :  { %s1812_s23 = smov 0   ;;  %s1814_s24 = smov 0  }
   0xb LB: > { %2163 = sst [smem:[#allocation15_spill]] %s1724_s23  ;;  %s1829_s11 = sadd.s32 4294967295, %s1728_s24   ;;  %s1728_s24 = sphi %s1814_s24, %s2185_s24   ;;  %s1724_s23 = sphi %s1812_s23, %s2187_s23   ;;  %s1720_s22 = sphi %s1810_s22, %s2189_s22   ;;  %s1716_s21 = sphi %s1808_s21, %s2188_s21  }
   0xc   : > { %s1292_s25 = sadd.s32 4294967294, %s1728_s24   ;;  %p76_p0 = scmp.ne.s32.totalorder %s1720_s22, %s1716_s21 }
   0xd   : > { %p2153_p1 = scmp.eq.s32.totalorder %s1829_s11, 0  ;;  %p316_p3 = scmp.eq.s32.totalorder %s1292_s25, 1 }
   0xe   : > { %p1293_p5 = scmp.ge.s32.totalorder %s1728_s24, 1  ;;  %p323_p7 = scmp.lt.s32.totalorder %s1728_s24, 3 }
   0xf   : > { %p1838_p4 = por %p2153_p1, %p76_p0  ;;  %p1843_p6 = por %p316_p3, %p76_p0 }
  0x10   : > { %p1848_p8 = pnand %p1293_p5, %p323_p7  ;;  %s1730_s29 = smov [#allocation5]  }
  0x11   : > { %s2164_s26 = scalar_select %p1838_p4, 1, 0 }
  0x12   : > { %s2165_s27 = scalar_select %p1843_p6, 1, 0 }
  0x13   : > { %s2166_s28 = scalar_select %p1848_p8, 1, 0 }
  0x14   : > { %s348_s30 = sshll.u32 %s1730_s29, 4  ;;  %p1443_p10 = pneg %p1848_p8  ;;  %s349_s30 = int_to_ptr.vmem [resolvable:$true] %s348_s30 }
  0x15   : > { %s1731_s13 = smov [#allocation7]   ;;  %s1732_s16 = smov [#allocation8]  }
  0x16   : > { %s359_s14 = sshll.u32 %s1731_s13, 4  ;;  %p1857_p11 = pnand %p1443_p10, %p2153_p1  ;;  %s360_s14 = int_to_ptr.vmem [resolvable:$true] %s359_s14 }
  0x17   : > { %s373_s17 = sshll.u32 %s1732_s16, 4  ;;  %s1561_s18 = scalar_lea.vmem %s349_s30, 16  ;;  %s1861_s17 = int_to_ptr.vmem [resolvable:$true] %s373_s17 }
  0x18   : > { %p1552_p12 = pneg %p1857_p11  ;;  %p1562_p13 = scmp.ne.s32.totalorder %s349_s30, %s1561_s18 }
  0x19   : > { %s1568_s19 = scalar_lea.vmem %s349_s30, 32  ;;  %p1569_p5 = scmp.lt.s32.totalorder %s349_s30, %s349_s30 }
  0x1a   : > { %p1564_p0 = pnand %p1562_p13, %p1552_p12  ;;  %p1570_p7 = scmp.lt.s32.totalorder %s1568_s19, %s1561_s18 }
  0x1c   : > { %p1565_p3 = pneg %p1564_p0  ;;  %p1571_p10 = por %p1570_p7, %p1569_p5 }
  0x1e   : > { %p1572_p9 = pnand %p1571_p10, %p1565_p3 }
  0x20   : > { %1575 = shalt.err (!%p1572_p9)
}
  0x21   : > { %s2168_s6 = sld [smem:[#allocation18_spill]]  ;;  %s1587_s29 = scalar_lea.vmem %s360_s14, 16 }
  0x22   : > { %p1588_p1 = scmp.ne.s32.totalorder %s360_s14, %s1587_s29  ;;  %s1594_s13 = scalar_lea.vmem %s360_s14, 32 }
  0x23   : > { %p1595_p0 = scmp.lt.s32.totalorder %s360_s14, %s360_s14  ;;  %p1596_p6 = scmp.lt.s32.totalorder %s1594_s13, %s1587_s29 }
  0x24   : > { %p1590_p2 = pnand %p1588_p1, %p1552_p12 }
  0x25   : > { %p1597_p4 = por %p1596_p6, %p1595_p0 }
  0x26   : > { %p1591_p13 = pneg %p1590_p2 }
  0x27   : > { %1446 = dma.hbm_to_vmem [thread:$0]  (!%p1857_p11), %s2168_s6, 16, %s349_s30, [#allocation6]  }
  0x28   : > { %p1598_p5 = pnand %p1597_p4, %p1591_p13 }
  0x2a   : > { %1601 = shalt.err (!%p1598_p5)
}
  0x2b   : > { %s2169_s7 = sld [smem:[#allocation19_spill]]  ;;  %s1613_s30 = scalar_lea.vmem %s1861_s17, 16 }
  0x2c   : > { %p1614_p1 = scmp.ne.s32.totalorder %s1861_s17, %s1613_s30  ;;  %s1620_s19 = scalar_lea.vmem %s1861_s17, 32 }
  0x2d   : > { %p1621_p4 = scmp.lt.s32.totalorder %s1861_s17, %s1861_s17  ;;  %p1622_p6 = scmp.lt.s32.totalorder %s1620_s19, %s1613_s30 }
  0x2e   : > { %p1616_p2 = pnand %p1614_p1, %p1552_p12 }
  0x2f   : > { %p1623_p3 = por %p1622_p6, %p1621_p4 }
  0x30   : > { %p1617_p9 = pneg %p1616_p2 }
  0x31   : > { %1449 = dma.hbm_to_vmem [thread:$0]  (!%p1857_p11), %s2169_s7, 16, %s360_s14, [#allocation6]  }
  0x32   : > { %p1624_p7 = pnand %p1623_p3, %p1617_p9 }
  0x34   : > { %1627 = shalt.err (!%p1624_p7)
}
  0x35   : > { %s2170_s9 = sld [smem:[#allocation20_spill]]  ;;  %s1896_s14 = sadd.s32 1, %s1728_s24  }
  0x36   : > { %2171 = sst [smem:[#allocation16_spill]] %s1896_s14  ;;  %s60_s15 = ssub.s32 %s1728_s24, %s1896_s14 }
  0x37   : > { %s63_s29 = sadd.s32 1, %s1724_s23  ;;  %p61_p12 = scmp.eq.s32.totalorder %s60_s15, 0 }
  0x38   : > { %p70_p10 = scmp.ne.s32.totalorder %s1724_s23, %s1720_s22  ;;  %p71_p13 = scmp.eq.s32.totalorder %s1728_s24, 0 }
  0x39   : > { %p1464_p0 = scmp.lt.s32.totalorder %s1728_s24, 2  ;;  %p2173_p1 = scmp.eq.s32.totalorder %s1829_s11, 1 }
  0x3a   : > { %s1906_s13 = scalar_select %p61_p12, %s1724_s23, %s63_s29  }
  0x3b   : > { %1452 = dma.hbm_to_vmem [thread:$0]  (!%p1857_p11), %s2170_s9, 16, %s1861_s17, [#allocation9]  }
  0x3c   : > { %2172 = sst [smem:[#allocation17_spill]] %s1906_s13  ;;  %p72_p5 = por %p71_p13, %p70_p10 }
  0x3d   : > { %p1910_p2 = por %p2173_p1, %p70_p10  ;;  %s397_s18 = sand.u32 1, %s1724_s23  }
  0x3e   : > { %s1298_s30 = sshll.u32 %s1728_s24, 4  ;;  %s400_s25 = scalar_lea.vmem [#allocation2], %s397_s18 }
  0x3f   : > { %s2174_s16 = scalar_select %p1910_p2, 1, 0 }
  0x40   : > { %s1919_s20 = scalar_lea.hbm %s2141_s1, %s1298_s30  ;;  %s407_s15 = sshll.u32 %s400_s25, 4  ;;  %s408_s15 = int_to_ptr.vmem [resolvable:$true] %s407_s15 }
  0x41   : > { %p1921_p11 = pnand %p1464_p0, %p72_p5  ;;  %s398_s6 = scalar_lea.sflag [#allocation3], %s397_s18 }
  0x42   : > { %s1628_s7 = scalar_lea.hbm %s1919_s20, 16  ;;  %s1633_s19 = scalar_lea.hbm %s2141_s1, 32 }
  0x43   : > { %p1629_p9 = scmp.ne.s32.totalorder %s1919_s20, %s1628_s7  ;;  %p1630_p4 = pneg %p1921_p11 }
  0x44   : > { %p1634_p7 = scmp.lt.s32.totalorder %s1919_s20, %s2141_s1  ;;  %p1635_p12 = scmp.lt.s32.totalorder %s1633_s19, %s1628_s7 }
  0x45   : > { %p1631_p6 = pnand %p1630_p4, %p1629_p9 }
  0x46   : > { %p1636_p10 = por %p1635_p12, %p1634_p7 }
  0x47   : > { %p1632_p3 = pneg %p1631_p6 }
  0x49   : > { %p1637_p13 = pnand %p1636_p10, %p1632_p3 }
  0x4b   : > { %1640 = shalt.err (!%p1637_p13)
}
  0x4c   : > { %s1641_s25 = scalar_lea.vmem %s408_s15, 16  ;;  %s1733_s18 = smov [#allocation2]  }
  0x4d   : > { %p1642_p0 = scmp.ne.s32.totalorder %s408_s15, %s1641_s25  ;;  %s1646_s23 = sshll.u32 %s1733_s18, 4  ;;  %s1647_s23 = int_to_ptr.vmem [resolvable:$false] %s1646_s23 }
  0x4e   : > { %s1648_s14 = scalar_lea.vmem %s1647_s23, 32  ;;  %p1649_p9 = scmp.lt.s32.totalorder %s408_s15, %s1647_s23 }
  0x4f   : > { %p1644_p5 = pnand %p1642_p0, %p1630_p4  ;;  %p1650_p6 = scmp.lt.s32.totalorder %s1648_s14, %s1641_s25 }
  0x51   : > { %p1645_p1 = pneg %p1644_p5  ;;  %p1651_p2 = por %p1650_p6, %p1649_p9 }
  0x53   : > { %p1652_p8 = pnand %p1651_p2, %p1645_p1 }
  0x55   : > { %1655 = shalt.err (!%p1652_p8)
}
  0x56   : > { %1456 = dma.hbm_to_vmem [thread:$0]  (!%p1921_p11), %s1919_s20, 16, %s408_s15, %s398_s6  }
  0x57   : > { %p2176_p3 = scmp.ne.s32.totalorder %s2166_s28, 0 }
  0x58   : > { %s1942_s7 = sand.u32 (!%p2176_p3), 1, %s1720_s22   ;;  %p2177_p4 = scmp.ne.s32.totalorder (!%p2176_p3), %s2164_s26, 0 }
  0x59   : > { %416 = sbr.rel (%p2176_p3) target bundleno = 3805 (0xedd), region = 68  ;;  %s419_s9 = scalar_lea.sflag (!%p2176_p3), [#allocation3], %s1942_s7 }
  0x5a   : > { %s421_s13 = scalar_lea.vmem (!%p2176_p3), [#allocation2], %s1942_s7 }
  0x5e   : > { %1699 = dma.done.wait (%p2177_p4), %s419_s9, 16  }
  0x5f   : > { %1701 = vsyncadd (%p2177_p4), %s419_s9, 4294967280  ;;  %p2178_p8 = scmp.eq.s32.totalorder %s1829_s11, 0 }
  0x61   : > { %1703 = dma.done.wait (%p2178_p8), [#allocation6], 32   ;;  %p2179_p2 = pmov %p2178_p8 }
  0x63   : > { %1705 = vsyncadd (%p2179_p2), [#allocation6], 4294967264  ;;  %p2180_p11 = pmov %p2179_p2 }
  0x64   : > { %p2181_p7 = pmov %p2179_p2 }
  0x65   : > { %1707 = dma.done.wait (%p2180_p11), [#allocation9], 16  }
  0x66   : > { %1709 = vsyncadd (%p2181_p7), [#allocation9], 4294967280  ;;  %p477_p12 = scmp.lt.s32.totalorder %s1829_s11, 1  ;;  %vm484_vm0 = vcmask 261120   ;;  %v1305_v11 = vld [vmem:[%s2142_s2] ss:$0 sm:$0xff] }
  0x67   : > { %v1512_v20 = vld [vmem:[%s2144_s4 + $0x8] sm:$0xff]   ;;  %v1734_v21 = vmov 0.0   ;;  %vm1735_vm1 = vmmov 0   ;;  %v1513_v22 = vld [vmem:[%s2144_s4] sm:$0xff]   ;;  %s1736_s9 = smov 96   ;;  %vm600_vm2 = vcmask 130048  }
  0x68   : > { %s478_s6 = scalar_select %p477_p12, %s1829_s11, 1  ;;  %1363 = vmatprep.subr.bf16.mxu1 %v1734_v21  ;;  %1367 = vmatprep.mubr.msk.bf16.mxu1 %vm1735_vm1, %v1734_v21  ;;  %v1306_v27 = vld [vmem:[%s2143_s3] ss:$0 sm:$0xff]  ;;  %vm647_vm3 = vcmask 64512   ;;  %vm665_vm4 = vcmask 1043456  }
  0x69   : > { %1364 = vmatpush3.bf16.msra.mxu1 %v1512_v20  ;;  %1389 = vmatprep.subr.bf16.mxu0 %v1734_v21  ;;  %v1310_v40 = vld [vmem:[%s421_s13] ss:$0 sm:$0xff]  ;;  %s1739_s13 = smov 112   ;;  %s1740_s28 = smov 48  }
  0x6a   : > { %s1304_s23 = sshll.u32 %s478_s6, 3  ;;  %1365 = vmatprep.subr.bf16.mxu1 %v1734_v21  ;;  %1391 = vmatprep.mubr.msk.bf16.mxu0 %vm1735_vm1, %v1734_v21  ;;  %s1737_s6 = smov 80  }
  0x6b   : > { %s480_s14 = scalar_lea.vmem %s2140_s0, %s1304_s23  ;;  %s1738_s23 = smov 64  }
  0x6c   : > { %v482_v0 = vld [vmem:[%s480_s14] sm:$0xff]  ;;  %p2182_p13 = scmp.ne.s32.totalorder %s2174_s16, 0  ;;  %s1742_s17 = smov [#allocation10]  }
  0x6d   : > { %v485_v1 = vsel %vm484_vm0, %v482_v0, 0.0  ;;  %1366 = vmatpush3.bf16.msra.mxu1 %v1513_v22  ;;  %s1660_s19 = sshll.u32 %s1742_s17, 4  ;;  %s1661_s19 = int_to_ptr.vmem [resolvable:$false] %s1660_s19 }
  0x6e   : > { %486 = vadd.xlane.f32.xlu0 %v485_v1  ;;  %1371 = vmatprep.subr.bf16.mxu1 %v1734_v21  ;;  %s1662_s25 = scalar_lea.vmem %s1661_s19, 256 }
  0xf7   : > { %v487_v2 = vpop.xlane.xlu0 %486 }
  0xf8   : > { %v489_v3 = vmul.f32 0.03125, %v487_v2 }
  0xfa   : > { %v490_v4 = vsub.f32 %v482_v0, %v489_v3 }
  0xfc   : > { %v491_v5 = vmul.f32 %v490_v4, %v490_v4 }
  0xfe   : > { %v492_v6 = vsel %vm484_vm0, %v491_v5, 0.0 }
  0xff   : > { %493 = vadd.xlane.f32.xlu0 %v492_v6 }
 0x188   : > { %v494_v7 = vpop.xlane.xlu0 %493 }
 0x189   : > { %v495_v8 = vmul.f32 0.03125, %v494_v7 }
 0x18b   : > { %v496_v9 = vadd.f32 1e-05, %v495_v8 }
 0x18d   : > { %1530 = vrsqrt.f32 %v496_v9 }
 0x19a   : > { %v1531_v10 = vpop.eup %1530 }
 0x19b   : > { %v498_v12 = vmul.f32 %v1531_v10, %v490_v4 }
 0x19d   : > { %v1968_v13 = vmul.f32 %v1305_v11, %v498_v12 }
 0x19f   : > { %v508_v14 = vsel %vm484_vm0, %v1968_v13, 0.0 }
 0x1a0   : > { %509 = vadd.xlane.f32.xlu1 %v508_v14 }
 0x229   : > { %v510_v15 = vpop.xlane.xlu1 %509 }
 0x22a   : > { %v511_v16 = vmul.f32 0.03125, %v510_v15  ;;  %v1515_v15 = vld [vmem:[%s2145_s5 + $0x8] sm:$0xff]  }
 0x22c   : > { %v512_v17 = vsub.f32 %v1968_v13, %v511_v16 }
 0x22e   : > { %v513_v18 = vmul.f32 %v512_v17, %v512_v17 }
 0x230   : > { %v514_v19 = vsel %vm484_vm0, %v513_v18, 0.0 }
 0x231   : > { %515 = vadd.xlane.f32.xlu1 %v514_v19  ;;  %v1514_v19 = vld [vmem:[%s2145_s5] sm:$0xff]  }
 0x2ba   : > { %v516_v23 = vpop.xlane.xlu1 %515 }
 0x2bb   : > { %v517_v24 = vmul.f32 0.03125, %v516_v23 }
 0x2bd   : > { %v518_v25 = vadd.f32 1e-05, %v517_v24 }
 0x2bf   : > { %1532 = vrsqrt.f32 %v518_v25 }
 0x2cc   : > { %v1533_v26 = vpop.eup %1532 }
 0x2cd   : > { %v520_v28 = vmul.f32 %v1533_v26, %v512_v17 }
 0x2cf   : > { %v527_v29 = vmul.f32 %v1306_v27, %v520_v28 }
 0x2d1   : > { %v528_v30 = vpack.c.bf16 %v527_v29, %v527_v29 }
 0x2d3   : > { %1368 = vmatmul.mubr.msk.bf16.vlgmr.msra.gmra.mxu1 %vm484_vm0, %v528_v30 }
 0x2d4   : > { %1373 = vmatprep.mubr.msk.bf16.mxu1 %vm1735_vm1, %v1734_v21 }
 0x393   : > { %v582_v31 = vpop.f32.mrf.mxu1 }
 0x394   : > { %v1994_v32 = vpack.c.bf16 %v582_v31, %v582_v31  ;;  %v588_v38 = vmul.f32 0.25, %v582_v31 }
 0x395   : > { %v1369_v33 = vpop.f32.mrf.mxu1 }
 0x396   : > { %598 = vrot.lane.b32.xlu0 %v1994_v32, %s1736_s9  ;;  %v589_v39 = vpack.c.bf16 %v588_v38, %v588_v38 }
 0x397   : > { %v585_v34 = vpop.f32.mrf.mxu1 }
 0x399   : > { %v1370_v35 = vpop.f32.mrf.mxu1 }
 0x39a   : > { %715 = vrot.lane.b32.xlu0 %v1994_v32, %s1737_s6 }
 0x408   : > { %v599_v36 = vpop.permute.xlu0 %598 }
 0x409   : > { %v605_v37 = vsel %vm600_vm2, %v599_v36, 0 }
 0x40a   : > { %1372 = vmatpush3.bf16.xpose.msra.mxu1 %v605_v37 }
 0x40b   : > { %1377 = vmatprep.subr.bf16.mxu1 %v1734_v21 }
 0x40c   : > { %v716_v57 = vpop.permute.xlu0 %715 }
 0x40d   : > { %v721_v59 = vsel %vm600_vm2, %v716_v57, 0  ;;  %v1516_v57 = vld [vmem:[%s2148_s8 + $0x10] ss:$8 sps:$4 sm:$0xff]  }
 0x411   : > { %1374 = vmatmul.mubr.msk.bf16.vlgmr.msra.gmra.mxu1 %vm600_vm2, %v589_v39 }
 0x412   : > { %1379 = vmatprep.mubr.msk.bf16.mxu1 %vm1735_vm1, %v1734_v21 }
 0x4d1   : > { %v641_v41 = vpop.f32.mrf.mxu1 }
 0x4d2   : > { %v642_v42 = vadd.f32 %v1310_v40, %v641_v41 }
 0x4d3   : > { %v1375_v43 = vpop.f32.mrf.mxu1 }
 0x4d4   : > { %v648_v44 = vsel %vm647_vm3, %v642_v42, -inf }
 0x4d5   : > { %649 = vmax.xlane.f32.xlu1 %v648_v44  ;;  %v644_v45 = vpop.f32.mrf.mxu1 }
 0x4d7   : > { %v1376_v46 = vpop.f32.mrf.mxu1 }
 0x55e   : > { %v650_v47 = vpop.xlane.xlu1 %649 }
 0x55f   : > { %v651_v48 = vsub.f32 %v642_v42, %v650_v47  ;;  %v1319_v47 = vld [vmem:[#allocation5] ss:$0 sm:$0xff] }
 0x561   : > { %v652_v49 = vmul.f32 1.442695, %v651_v48 }
 0x563   : > { %1534 = vpow2.f32 %v652_v49 }
 0x570   : > { %v1535_v50 = vpop.eup %1534 }
 0x571   : > { %v654_v51 = vsel %vm647_vm3, %v1535_v50, 0.0 }
 0x572   : > { %655 = vadd.xlane.f32.xlu1 %v654_v51 }
 0x583   : > { %660 = vrot.lane.b32.xlu1 %v1994_v32, %s1738_s23 }
 0x587   : > { %713 = vrot.lane.b32.xlu1 %v589_v39, %s1739_s13  ;;  %s1303_s13 = sshll.u32 %s1942_s7, 3 }
 0x588   : > { %s476_s26 = scalar_lea.vmem [#allocation10], %s1303_s13 }
 0x589   : > { %s1184_s14 = sshll.u32 %s476_s26, 4  ;;  %s2098_s14 = int_to_ptr.vmem [resolvable:$true] %s1184_s14 }
 0x58a   : > { %s1656_s30 = scalar_lea.vmem %s2098_s14, 128  ;;  %p1663_p1 = scmp.lt.s32.totalorder %s2098_s14, %s1661_s19 }
 0x58b   : > { %p1657_p10 = scmp.ne.s32.totalorder %s2098_s14, %s1656_s30  ;;  %p1664_p9 = scmp.lt.s32.totalorder %s1662_s25, %s1656_s30 }
 0x58d   : > { %p1658_p0 = pnand %p1657_p10, %p2182_p13  ;;  %p1665_p6 = por %p1664_p9, %p1663_p1 }
 0x58f   : > { %p1659_p5 = pneg %p1658_p0 }
 0x591   : > { %p1666_p3 = pnand %p1665_p6, %p1659_p5 }
 0x5fb   : > { %v656_v52 = vpop.xlane.xlu1 %655 }
 0x5fc   : > { %1536 = vrcp.f32 %v656_v52 }
 0x5ff   : > { %v661_v53 = vpop.permute.xlu1 %660 }
 0x600   : > { %v667_v54 = vsel %vm665_vm4, %v661_v53, 0 }
 0x601   : > { %1378 = vmatpush3.bf16.msra.mxu1 %v667_v54 }
 0x602   : > { %1383 = vmatprep.subr.bf16.mxu1 %v1734_v21 }
 0x603   : > { %v714_v60 = vpop.permute.xlu1 %713 }
 0x609   : > { %v1537_v55 = vpop.eup %1536 }
 0x60a   : > { %v658_v56 = vmul.f32 %v1537_v55, %v1535_v50 }
 0x60c   : > { %v659_v58 = vpack.c.bf16 %v658_v56, %v658_v56 }
 0x60e   : > { %1380 = vmatmul.mubr.msk.bf16.vlgmr.msra.gmra.mxu1 %vm647_vm3, %v659_v58  ;;  %v1521_v58 = vld [vmem:[%s2148_s8 + $0x4] ss:$8 sps:$4 sm:$0xff]  }
 0x60f   : > { %1384 = vmatpush3.bf16.xpose.msra.mxu1 %v721_v59  ;;  %1385 = vmatprep.mubr.msk.bf16.mxu1 %vm1735_vm1, %v1734_v21  ;;  %v1741_v59 = vmov 0  }
 0x610   : > { %1395 = vmatprep.subr.bf16.mxu1 %v1734_v21 }
 0x616   : > { %1386 = vmatmul.mubr.msk.bf16.vlgmr.msra.gmra.mxu1 %vm600_vm2, %v714_v60  ;;  %v1519_v60 = vld [vmem:[%s2148_s8] ss:$8 sps:$4 sm:$0xff]  }
 0x617   : > { %1397 = vmatprep.mubr.msk.bf16.mxu1 %vm1735_vm1, %v1734_v21  ;;  %1396 = vmatpush3.bf16.msra.mxu1 %v1515_v15 }
 0x6ce   : > { %v703_v61 = vpop.f32.mrf.mxu1 }
 0x6cf   : > { %v709_v22 = vpack.c.bf16 %v703_v61, %v703_v61 }
 0x6d0   : > { %v1381_v62 = vpop.f32.mrf.mxu1 }
 0x6d2   : > { %v706_v63 = vpop.f32.mrf.mxu1 }
 0x6d4   : > { %v1382_v0 = vpop.f32.mrf.mxu1 }
 0x6d6   : > { %v757_v1 = vpop.f32.mrf.mxu1 }
 0x6d7   : > { %v758_v2 = vadd.f32 %v1310_v40, %v757_v1  ;;  %v1320_v1 = vld [vmem:[#allocation7] ss:$0 sm:$0xff] }
 0x6d8   : > { %v1387_v3 = vpop.f32.mrf.mxu1 }
 0x6d9   : > { %v763_v4 = vsel %vm647_vm3, %v758_v2, -inf }
 0x6da   : > { %764 = vmax.xlane.f32.xlu0 %v763_v4  ;;  %v760_v5 = vpop.f32.mrf.mxu1 }
 0x6dc   : > { %v1388_v6 = vpop.f32.mrf.mxu1 }
 0x6f0   : > { %775 = vrot.lane.b32.xlu0 %v1994_v32, %s1740_s28  ;;  %s1336_s28 = sshll.u32 %s1829_s11, 7  ;;  %s1171_s11 = scalar_lea.sflag [#allocation4], %s1942_s7 }
 0x6f1   : > { %s2096_s29 = scalar_lea.hbm %s2152_s12, %s1336_s28 }
 0x763   : > { %v765_v7 = vpop.xlane.xlu0 %764 }
 0x764   : > { %v766_v8 = vsub.f32 %v758_v2, %v765_v7 }
 0x766   : > { %v767_v9 = vmul.f32 1.442695, %v766_v8 }
 0x767   : > { %v776_v10 = vpop.permute.xlu0 %775 }
 0x768   : > { %1538 = vpow2.f32 %v767_v9  ;;  %v781_v11 = vsel %vm665_vm4, %v776_v10, 0 }
 0x769   : > { %1390 = vmatpush3.bf16.msra.mxu0 %v781_v11 }
 0x76a   : > { %1401 = vmatprep.subr.bf16.mxu0 %v1734_v21 }
 0x775   : > { %v1539_v12 = vpop.eup %1538 }
 0x776   : > { %v769_v14 = vsel %vm647_vm3, %v1539_v12, 0.0 }
 0x777   : > { %770 = vadd.xlane.f32.xlu1 %v769_v14 }
 0x800   : > { %v771_v16 = vpop.xlane.xlu1 %770 }
 0x801   : > { %1540 = vrcp.f32 %v771_v16  ;;  %v1522_v16 = vld [vmem:[%s2150_s10 + $0x38] sm:$0xff]  }
 0x80e   : > { %v1541_v17 = vpop.eup %1540 }
 0x80f   : > { %v773_v18 = vmul.f32 %v1541_v17, %v1539_v12  ;;  %v1523_v17 = vld [vmem:[%s2150_s10 + $0x30] sm:$0xff]  }
 0x811   : > { %v774_v20 = vpack.c.bf16 %v773_v18, %v773_v18 }
 0x813   : > { %1392 = vmatmul.mubr.msk.bf16.vlgmr.msra.gmra.mxu0 %vm647_vm3, %v774_v20 }
 0x814   : > { %1402 = vmatpush3.bf16.msra.mxu0 %v1514_v19  ;;  %1403 = vmatprep.mubr.msk.bf16.mxu0 %vm1735_vm1, %v1734_v21 }
 0x815   : > { %1407 = vmatprep.subr.bf16.mxu0 %v1734_v21 }
 0x81b   : > { %1404 = vmatmul.mubr.msk.bf16.vlgmr.msra.gmra.mxu0 %vm600_vm2, %v709_v22 }
 0x81c   : > { %1423 = vmatprep.mubr.msk.bf16.mxu0 %vm1735_vm1, %v1734_v21  ;;  %1408 = vmatpush3.bf16.msra.mxu0 %v1522_v16 }
 0x81d   : > { %1409 = vmatprep.subr.bf16.mxu0 %v1734_v21 }
 0x820   : > { %1410 = vmatpush3.bf16.msra.mxu0 %v1523_v17 }
 0x821   : > { %1411 = vmatprep.subr.bf16.mxu0 %v1734_v21 }
 0x8d3   : > { %v817_v23 = vpop.f32.mrf.mxu0 }
 0x8d4   : > { %v823_v24 = vpack.c.bf16 %v817_v23, %v817_v23  ;;  %v1524_v23 = vld [vmem:[%s2150_s10 + $0x28] sm:$0xff]  }
 0x8d5   : > { %v1393_v25 = vpop.f32.mrf.mxu0  ;;  %1412 = vmatpush3.bf16.msra.mxu0 %v1524_v23 }
 0x8d6   : > { %1398 = vmatmul.mubr.msk.bf16.vlgmr.msra.gmra.mxu1 %vm600_vm2, %v823_v24  ;;  %1413 = vmatprep.subr.bf16.mxu0 %v1734_v21  ;;  %v1525_v24 = vld [vmem:[%s2150_s10 + $0x20] sm:$0xff]   ;;  %v1526_v25 = vld [vmem:[%s2150_s10 + $0x18] sm:$0xff]  }
 0x8d7   : > { %v820_v26 = vpop.f32.mrf.mxu0  ;;  %1027 = vmatprep.mubr.bf16.mxu1 %v1741_v59 }
 0x8d8   : > { %v1527_v26 = vld [vmem:[%s2150_s10 + $0x10] sm:$0xff]  }
 0x8d9   : > { %v1394_v27 = vpop.f32.mrf.mxu0  ;;  %1414 = vmatpush3.bf16.msra.mxu0 %v1525_v24 }
 0x8da   : > { %1415 = vmatprep.subr.bf16.mxu0 %v1734_v21  ;;  %v1528_v27 = vld [vmem:[%s2150_s10 + $0x8] sm:$0xff]  }
 0x8db   : > { %v918_v28 = vpop.f32.mrf.mxu0 }
 0x8dd   : > { %v1405_v29 = vpop.f32.mrf.mxu0  ;;  %1416 = vmatpush3.bf16.msra.mxu0 %v1526_v25 }
 0x8de   : > { %1417 = vmatprep.subr.bf16.mxu0 %v1734_v21 }
 0x8df   : > { %v921_v30 = vpop.f32.mrf.mxu0 }
 0x8e1   : > { %v1406_v31 = vpop.f32.mrf.mxu0  ;;  %1418 = vmatpush3.bf16.msra.mxu0 %v1527_v26 }
 0x8e2   : > { %1419 = vmatprep.subr.bf16.mxu0 %v1734_v21 }
 0x8e5   : > { %1420 = vmatpush3.bf16.msra.mxu0 %v1528_v27 }
 0x8e6   : > { %1421 = vmatprep.subr.bf16.mxu0 %v1734_v21 }
 0x996   : > { %v869_v32 = vpop.f32.mrf.mxu1 }
 0x997   : > { %v919_v33 = vadd.f32 %v918_v28, %v869_v32  ;;  %v1529_v28 = vld [vmem:[%s2150_s10] sm:$0xff]  }
 0x998   : > { %v1399_v34 = vpop.f32.mrf.mxu1  ;;  %1422 = vmatpush3.bf16.msra.mxu0 %v1529_v28 }
 0x999   : > { %v925_v35 = vsel %vm484_vm0, %v919_v33, 0.0 }
 0x99a   : > { %926 = vadd.xlane.f32.xlu1 %v925_v35  ;;  %v872_v36 = vpop.f32.mrf.mxu1 }
 0x99c   : > { %v1400_v37 = vpop.f32.mrf.mxu1 }
 0xa23   : > { %v927_v38 = vpop.xlane.xlu1 %926 }
 0xa24   : > { %v928_v39 = vmul.f32 0.03125, %v927_v38 }
 0xa26   : > { %v929_v40 = vsub.f32 %v919_v33, %v928_v39  ;;  %v1326_v33 = vld [vmem:[#allocation8] ss:$0 sm:$0xff] }
 0xa28   : > { %v930_v41 = vmul.f32 %v929_v40, %v929_v40 }
 0xa2a   : > { %v931_v42 = vsel %vm484_vm0, %v930_v41, 0.0 }
 0xa2b   : > { %932 = vadd.xlane.f32.xlu1 %v931_v42 }
 0xab4   : > { %v933_v43 = vpop.xlane.xlu1 %932 }
 0xab5   : > { %v934_v44 = vmul.f32 0.03125, %v933_v43 }
 0xab7   : > { %v935_v45 = vadd.f32 1e-05, %v934_v44 }
 0xab9   : > { %1542 = vrsqrt.f32 %v935_v45 }
 0xac6   : > { %v1543_v46 = vpop.eup %1542 }
 0xac7   : > { %v937_v48 = vmul.f32 %v1543_v46, %v929_v40 }
 0xac9   : > { %v944_v49 = vmul.f32 %v1319_v47, %v937_v48 }
 0xacb   : > { %v2040_v50 = vadd.f32 %v944_v49, %v1968_v13  ;;  %v1518_v13 = vld [vmem:[%s2148_s8 + $0x14] ss:$8 sps:$4 sm:$0xff]  }
 0xacc   : > { %1007 = vmatprep.subr.bf16.mxu1 %v1518_v13 }
 0xacd   : > { %v947_v51 = vsel %vm484_vm0, %v2040_v50, 0.0  ;;  %1008 = vmatpush1.bf16.msra.mxu1 %v1516_v57 }
 0xace   : > { %948 = vadd.xlane.f32.xlu1 %v947_v51  ;;  %1009 = vmatprep.subr.bf16.mxu1 %v1521_v58 }
 0xad1   : > { %1010 = vmatpush1.bf16.msra.mxu1 %v1519_v60 }
 0xb57   : > { %v949_v52 = vpop.xlane.xlu1 %948 }
 0xb58   : > { %v950_v53 = vmul.f32 0.03125, %v949_v52 }
 0xb5a   : > { %v951_v54 = vsub.f32 %v2040_v50, %v950_v53 }
 0xb5c   : > { %v952_v55 = vmul.f32 %v951_v54, %v951_v54 }
 0xb5e   : > { %v953_v56 = vsel %vm484_vm0, %v952_v55, 0.0 }
 0xb5f   : > { %954 = vadd.xlane.f32.xlu1 %v953_v56 }
 0xbe8   : > { %v955_v61 = vpop.xlane.xlu1 %954 }
 0xbe9   : > { %v956_v62 = vmul.f32 0.03125, %v955_v61 }
 0xbeb   : > { %v957_v63 = vadd.f32 1e-05, %v956_v62 }
 0xbed   : > { %1544 = vrsqrt.f32 %v957_v63 }
 0xbfa   : > { %v1545_v0 = vpop.eup %1544 }
 0xbfb   : > { %v959_v2 = vmul.f32 %v1545_v0, %v951_v54 }
 0xbfd   : > { %v966_v3 = vmul.f32 %v1320_v1, %v959_v2 }
 0xbff   : > { %v967_v4 = vpack.c.bf16 %v966_v3, %v966_v3 }
 0xc01   : > { %1325 = vmatmul.mubr.msk.bf16.vlgmr.msra.gmra.mxu1 %vm484_vm0, %v967_v4 }
 0xcc1   : > { %v1029_v5 = vpop.f32.mrf.mxu1 }
 0xcc3   : > { %v1031_v6 = vpop.f32.mrf.mxu1 }
 0xcc4   : > { %v1038_v7 = vmul.f32 0.70710677, %v1031_v6  ;;  %v1036_v11 = vmul.f32 0.5, %v1031_v6 }
 0xcc5   : > { %v1033_v8 = vpop.f32.mrf.mxu1 }
 0xcc6   : > { %1546 = verf.f32 %v1038_v7 }
 0xcc7   : > { %v1034_v9 = vpop.f32.mrf.mxu1 }
 0xcd3   : > { %v1547_v10 = vpop.eup %1546 }
 0xcd4   : > { %v1040_v12 = vadd.f32 1.0, %v1547_v10 }
 0xcd6   : > { %v1041_v14 = vmul.f32 %v1040_v12, %v1036_v11 }
 0xcd8   : > { %v1042_v15 = vmul.f32 %v1041_v14, %v1029_v5 }
 0xcda   : > { %1044 = vadd.xlane.f32.xlu0 %v1042_v15 }
 0xd63   : > { %v1045_v18 = vpop.xlane.xlu0 %1044 }
 0xd64   : > { %v1047_v19 = vmul.f32 0.0078125, %v1045_v18 }
 0xd66   : > { %v1048_v20 = vsub.f32 %v1042_v15, %v1047_v19 }
 0xd68   : > { %v1049_v22 = vmul.f32 %v1048_v20, %v1048_v20 }
 0xd6a   : > { %1050 = vadd.xlane.f32.xlu1 %v1049_v22 }
 0xdf3   : > { %v1051_v29 = vpop.xlane.xlu1 %1050 }
 0xdf4   : > { %v1052_v30 = vmul.f32 0.0078125, %v1051_v29 }
 0xdf6   : > { %v1053_v31 = vadd.f32 1e-05, %v1052_v30 }
 0xdf8   : > { %1548 = vrsqrt.f32 %v1053_v31 }
 0xe05   : > { %v1549_v32 = vpop.eup %1548 }
 0xe06   : > { %v1055_v34 = vmul.f32 %v1549_v32, %v1048_v20 }
 0xe08   : > { %v1062_v35 = vmul.f32 %v1326_v33, %v1055_v34 }
 0xe0a   : > { %v1063_v36 = vpack.c.bf16 %v1062_v35, %v1062_v35 }
 0xe0c   : > { %1424 = vmatmul.mubr.bf16.vlgmr.msra.gmra.mxu0 %v1063_v36 }
 0xecc   : > { %v1162_v37 = vpop.f32.mrf.mxu0 }
 0xecd   : > { %v1168_v21 = vadd.f32 %v1162_v37, %v2040_v50 }
 0xece   : > { %v1425_v38 = vpop.f32.mrf.mxu0 }
 0xecf   : > { %1169 = vst.msk [vmem:[%s476_s26] sm:$0xff] %vm484_vm0, %v1168_v21 }
 0xed0   : > { %v1165_v39 = vpop.f32.mrf.mxu0 }
 0xed1   : > { %1669 = shalt.err (!%p1666_p3)
}
 0xed2   : > { %s1670_s18 = scalar_lea.hbm %s2096_s29, 128  ;;  %s1674_s6 = scalar_lea.hbm %s2152_s12, 256 }
 0xed3   : > { %p1671_p4 = scmp.ne.s32.totalorder %s2096_s29, %s1670_s18  ;;  %p1675_p11 = scmp.lt.s32.totalorder %s2096_s29, %s2152_s12 }
 0xed4   : > { %p1676_p7 = scmp.lt.s32.totalorder %s1674_s6, %s1670_s18 }
 0xed5   : > { %p1672_p8 = pnand %p1671_p4, %p2182_p13 }
 0xed6   : > { %p1677_p12 = por %p1676_p7, %p1675_p11 }
 0xed7   : > { %p1673_p2 = pneg %p1672_p8 }
 0xed9   : > { %p1678_p10 = pnand %p1677_p12, %p1673_p2 }
 0xedb   : > { %1681 = shalt.err (!%p1678_p10)
}
 0xedc   : > { %1441 = dma.vmem_to_hbm [thread:$0]  (%p2182_p13), %s2098_s14, 128, %s2096_s29, %s1171_s11   ;;  %v1426_v40 = vpop.f32.mrf.mxu0 }
 0xedd PF: > { %s1196_s28 = sand.u32 1, %s1716_s21   ;;  %p2183_p0 = scmp.ne.s32.totalorder %s2165_s27, 0 }
 0xede   : > { %p2184_p5 = scmp.ge.s32.totalorder %s1728_s24, 2  ;;  %s1197_s26 = scalar_lea.sflag [#allocation4], %s1196_s28 }
 0xee0   : > { %p1458_p1 = pnand %p2184_p5, %p2183_p0 }
 0xee2   : > { %p1459_p9 = pneg %p1458_p1 }
 0xee4   : > { %1711 = dma.done.wait (%p1459_p9), %s1197_s26, 128  }
 0xee5   : > { %1713 = vsyncadd (%p1459_p9), %s1197_s26, 4294967168  ;;  %s2185_s24 = sld [smem:[#allocation16_spill]]  ;;  %s2188_s21 = smov %s1720_s22 }
 0xee6   : > { %s2186_s20 = sld [smem:[#allocation15_spill]] }
 0xee7   : > { %s2187_s23 = sld [smem:[#allocation17_spill]] }
 0xeeb   : > { %p27_p6 = scmp.ge.s32.totalorder %s2185_s24, 4  }
 0xeec   : > { %s2189_s22 = smov %s2186_s20 }
 0xeed   :  { %29 = sbr.rel (!%p27_p6) target bundleno = 11 (0xb), region = 128 }
 0xef2   :  { %1202 = vsyncpa [#allocation3], 1 }
 0xef3   :  { %1204 = vsyncpa [#allocation3 + $0x1], 1 }
 0xef4   :  { %1205 = vsyncpa [#allocation6], 1 }
 0xef5   :  { %1206 = vsyncpa [#allocation9], 1 }
 0xef6   :  { %1207 = vsyncpa [#allocation4], 1 }
 0xef7   :  { %1209 = vsyncpa [#allocation4 + $0x1], 1 }

</bundles_post_ra>
